<compile_context>
chip_gen: v7x
topology: tpu7x:2x2x1
jax: 0.10.0
libtpu: 0.0.40
codegen_flags: <defaults>
</compile_context>

<pallas_src>
import functools

import jax
import jax.numpy as jnp
from jax.experimental import pallas as pl
from jax.experimental.pallas import tpu as pltpu

LEAKY_SLOPE = 0.2
BN_EPS = 1e-5


@functools.lru_cache(maxsize=None)
def _hw_params():
    """Per-generation VMEM limit, tile budget and v5e flag (trace-time query)."""
    vmem_cap = 64 << 20            # conservative default (v7x per-TC VMEM)
    is_v5e = False
    try:
        kind = jax.devices()[0].device_kind.lower()
        is_v5e = ("v5 lite" in kind) or ("v5e" in kind) or ("v5litepod" in kind)
    except Exception:
        pass
    try:
        vmem_cap = int(getattr(pltpu.get_tpu_info(), "vmem_capacity_bytes", vmem_cap))
    except Exception:
        pass
    if vmem_cap >= (100 << 20):    # v5e / v6e: 128 MiB physical VMEM
        return 96 << 20, 36 << 20, is_v5e
    return 48 << 20, 20 << 20, is_v5e   # v7x: 64 MiB per TensorCore


def _pick_row_tile(ho, wo, k_p, tn, budget_bytes):
    """Largest th whose full pipelined footprint fits the budget (ragged ok)."""
    w_bytes = 2 * 2 * k_p * tn * 2            # double-buffered bf16 weight block
    best = 1
    for th in range(1, ho + 1):
        x_bytes = 2 * (th + 1) * wo * k_p * 2  # double-buffered bf16 input block
        y_bytes = 2 * th * wo * tn * 2         # double-buffered bf16 output block
        tmp_bytes = 3 * th * wo * tn * 4       # f32 acc + elementwise temporaries
        if w_bytes + x_bytes + y_bytes + tmp_bytes <= budget_bytes:
            best = th
    return best


def _make_conv_kernel(th, wo):
    """4x4/s2 conv row-tile via 2 bf16 MXU matmuls + fused BN partial stats.

    x_ref : ((th+1)*wo, K) bf16   column-folded rows incl. duplicated dy-halo
    w_ref : (2, K, tn)     bf16   one (K, tn) slab per dy shift
    b_ref : (1, tn)        f32    conv bias
    y_ref : (th*wo, tn)    bf16   conv output tile (bias added)
    st_ref: (2, tn)        f32    row0 = sum(acc), row1 = sum(acc^2) (pre-bias)
    """
    m = th * wo

    def kernel(x_ref, w_ref, b_ref, y_ref, st_ref):
        a0 = x_ref[0:m, :]              # dy = 0 rows
        a1 = x_ref[wo:wo + m, :]        # dy = 1 rows (halo baked into layout)
        acc = jnp.dot(a0, w_ref[0], preferred_element_type=jnp.float32)
        acc = acc + jnp.dot(a1, w_ref[1], preferred_element_type=jnp.float32)

        # Bias-shifted BN partial statistics (f32).  Zero-padded ragged rows
        # give acc == 0 exactly, so they contribute nothing -> no masking.
        s = jnp.sum(acc, axis=0, keepdims=True)
        ssq = jnp.sum(acc * acc, axis=0, keepdims=True)
        st_ref[...] = jnp.concatenate([s, ssq], axis=0)

        y_ref[...] = (acc + b_ref[...]).astype(y_ref.dtype)

    return kernel


@jax.jit
def unet_down_block(x, conv_w, conv_b, bn_gamma, bn_beta):
    """LeakyReLU(0.2) -> Dropout2d(identity) -> Conv2d(4,2,1,bias) -> BN(train)."""
    n, cin, h, w = x.shape
    cout = conv_w.shape[0]
    assert conv_w.shape == (cout, cin, 4, 4)
    assert h % 2 == 0 and w % 2 == 0, "strided 4/2/1 conv expects even H, W"
    ho, wo = h // 2, w // 2
    c8 = 8 * cin
    k_p = ((c8 + 127) // 128) * 128                 # lane-dense contraction dim
    cout_p = ((cout + 127) // 128) * 128

    vmem_limit, tile_budget, is_v5e = _hw_params()
    tn = 128 if (is_v5e or cout_p % 256 != 0) else 256
    jt = cout_p // tn

    # ---------- fused XLA pre-pass over the un-replicated input ----------
    # NCHW->NHWC, LeakyReLU (f32), bf16 cast, zero-pad (p=1), space-to-depth 2,
    # fold kx into the channel axis (K = 8*Cin), pad lanes, duplicate the one
    # dy-halo row per row tile.
    # TODO(synk): Dropout2d is inference-mode identity here; training mode would
    # zero whole channels with prob 0.2 and rescale by 1/0.8.
    # TODO(synk): keeping the surrounding network NHWC would remove this
    # NCHW<->NHWC conversion pass entirely.
    xt = jnp.transpose(x, (0, 2, 3, 1))
    xt = jnp.where(xt > 0, xt, LEAKY_SLOPE * xt).astype(jnp.bfloat16)
    xp = jnp.pad(xt, ((0, 0), (1, 1), (1, 1), (0, 0)))
    s2d = xp.reshape(n, ho + 1, 2, wo + 1, 2, cin)
    s2d = jnp.transpose(s2d, (0, 1, 3, 2, 4, 5)).reshape(n, ho + 1, wo + 1, 4 * cin)
    x_cols = jnp.concatenate([s2d[:, :, :wo, :], s2d[:, :, 1:, :]], axis=-1)
    x_cols = jnp.pad(x_cols, ((0, 0), (0, 0), (0, 0), (0, k_p - c8)))

    th = _pick_row_tile(ho, wo, k_p, tn, tile_budget)
    if n == 1 and jt == 1 and ho >= 2:          # keep >=2 parallel steps (v7x 2 TCs)
        th = min(th, -(-ho // 2))
    ht = -(-ho // th)
    ho_pad = ht * th
    x_cols = jnp.pad(x_cols, ((0, 0), (0, ho_pad - ho), (0, 0), (0, 0)))
    row_idx = jnp.arange(ht)[:, None] * th + jnp.arange(th + 1)[None, :]
    x_tiles = jnp.take(x_cols, row_idx, axis=1)              # (n, ht, th+1, wo, K)
    x_tiles = x_tiles.reshape(n, ht, (th + 1) * wo, k_p)

    # Weights: (Cout, Cin, 4, 4) -> (2 dy-shifts, 8*Cin, Cout); K axis ordered
    # (c_off, a, b, ci) to match x_cols; zero-padded, bf16.
    wr = conv_w.reshape(cout, cin, 2, 2, 2, 2)               # (co, ci, dy, a, cf, b)
    wr = jnp.transpose(wr, (2, 4, 3, 5, 1, 0)).reshape(2, c8, cout)
    w_p = jnp.pad(wr, ((0, 0), (0, k_p - c8), (0, cout_p - cout))).astype(jnp.bfloat16)
    b_p = jnp.pad(conv_b, (0, cout_p - cout)).astype(jnp.float32).reshape(1, cout_p)

    m = th * wo
    cost = pl.CostEstimate(
        flops=2 * n * ht * m * (2 * k_p) * cout_p,
        transcendentals=0,
        bytes_accessed=int(x_tiles.size) * 2 + int(w_p.size) * 2
        + n * ht * m * cout_p * 2 + n * ht * 2 * cout_p * 4,
    )
    cparams = pltpu.CompilerParams(
        dimension_semantics=("parallel", "parallel", "parallel"),
        vmem_limit_bytes=vmem_limit,
    )

    y, pstats = pl.pallas_call(
        _make_conv_kernel(th, wo),
        grid=(jt, n, ht),        # j outermost => each weight slab is DMA'd once
        in_specs=[
            pl.BlockSpec((None, None, (th + 1) * wo, k_p),
                         lambda j, b, t: (b, t, 0, 0)),
            pl.BlockSpec((2, k_p, tn), lambda j, b, t: (0, 0, j)),
            pl.BlockSpec((1, tn), lambda j, b, t: (0, j)),
        ],
        out_specs=[
            pl.BlockSpec((None, None, m, tn), lambda j, b, t: (b, t, 0, j)),
            pl.BlockSpec((None, None, 2, tn), lambda j, b, t: (b, t, 0, j)),
        ],
        out_shape=(
            jax.ShapeDtypeStruct((n, ht, m, cout_p), jnp.bfloat16),
            jax.ShapeDtypeStruct((n, ht, 2, cout_p), jnp.float32),
        ),
        compiler_params=cparams,
        cost_estimate=cost,
    )(x_tiles, w_p, b_p)

    # BatchNorm finalize on the tiny f32 partials (biased variance, like PyTorch
    # training-mode BN).  Sums are bias-shifted -> less cancellation.
    cnt = float(n * ho * wo)
    sums = jnp.sum(pstats[:, :, 0, :], axis=(0, 1))
    sumsq = jnp.sum(pstats[:, :, 1, :], axis=(0, 1))
    mean_nb = sums / cnt
    var = jnp.maximum(sumsq / cnt - mean_nb * mean_nb, 0.0)
    mean = mean_nb + b_p[0]
    gamma_p = jnp.pad(bn_gamma, (0, cout_p - cout), constant_values=1.0)
    beta_p = jnp.pad(bn_beta, (0, cout_p - cout))
    scale = gamma_p * jax.lax.rsqrt(var + BN_EPS)
    shift = beta_p - mean * scale

    # Fused jnp epilogue: scale/shift + channel slice + NHWC->NCHW in one pass.
    y_full = y.reshape(n, ho_pad, wo, cout_p)[:, :ho]
    out = y_full.astype(jnp.float32) * scale + shift
    return jnp.transpose(out[..., :cout], (0, 3, 1, 2))


def reference_forward(x, conv_w, conv_b, bn_gamma, bn_beta):
    """Pure-JAX reference of the same forward (bf16 operand rounding matched)."""
    a = jnp.where(x > 0, x, LEAKY_SLOPE * x)
    a = a.astype(jnp.bfloat16).astype(jnp.float32)
    wq = conv_w.astype(jnp.bfloat16).astype(jnp.float32)
    y = jax.lax.conv_general_dilated(
        a, wq, window_strides=(2, 2), padding=((1, 1), (1, 1)),
        dimension_numbers=("NCHW", "OIHW", "NCHW"))
    y = y + conv_b.reshape(1, -1, 1, 1)
    mean = jnp.mean(y, axis=(0, 2, 3), keepdims=True)
    var = jnp.mean((y - mean) ** 2, axis=(0, 2, 3), keepdims=True)
    out = (y - mean) * jax.lax.rsqrt(var + BN_EPS)
    return out * bn_gamma.reshape(1, -1, 1, 1) + bn_beta.reshape(1, -1, 1, 1)


if __name__ == "__main__":
    key = jax.random.PRNGKey(0)
    kx, kw, kb = jax.random.split(key, 3)
    n, cin, h, w = 2, 4, 16, 16
    cout = 8
    x = jax.random.normal(kx, (n, cin, h, w), jnp.float32)
    conv_w = jax.random.normal(kw, (cout, cin, 4, 4), jnp.float32) * 0.1
    conv_b = jax.random.normal(kb, (cout,), jnp.float32) * 0.1
    gamma = jnp.ones((cout,), jnp.float32)
    beta = jnp.zeros((cout,), jnp.float32)

    out = jax.block_until_ready(unet_down_block(x, conv_w, conv_b, gamma, beta))
    assert out.shape == (n, cout, h // 2, w // 2), out.shape

    ref = reference_forward(x, conv_w, conv_b, gamma, beta)
    err = float(jnp.max(jnp.abs(out - ref)))
    assert err < 5e-2, f"max abs error too large: {err}"
    print("KERNEL_OK")
</pallas_src>

<mosaic_0001>
module attributes {stable_mosaic.version = 11 : i64} {
  func.func @kernel(%arg0: i32, %arg1: i32, %arg2: i32, %arg3: memref<1x1x72x128xbf16, #tpu.memory_space<vmem>>, %arg4: memref<2x128x128xbf16, #tpu.memory_space<vmem>>, %arg5: memref<1x128xf32, #tpu.memory_space<vmem>>, %arg6: memref<1x1x64x128xbf16, #tpu.memory_space<vmem>>, %arg7: memref<1x1x2x128xf32, #tpu.memory_space<vmem>>) attributes {dimension_semantics = [#tpu.dimension_semantics<parallel>, #tpu.dimension_semantics<parallel>, #tpu.dimension_semantics<parallel>], iteration_bounds = array<i64: 1, 2, 1>, scalar_prefetch = 0 : i64, scratch_operands = 0 : i64, tpu.core_type = #tpu.core_type<tc>, window_params = [{transform_indices = @transform_0, window_bounds = array<i64: 1, 1, 72, 128>}, {transform_indices = @transform_1, window_bounds = array<i64: 2, 128, 128>}, {transform_indices = @transform_2, window_bounds = array<i64: 1, 128>}, {transform_indices = @transform_3, window_bounds = array<i64: 1, 1, 64, 128>}, {transform_indices = @transform_4, window_bounds = array<i64: 1, 1, 2, 128>}]} {
    %c0 = arith.constant 0 : index
    %c0_0 = arith.constant 0 : index
    %c0_1 = arith.constant 0 : index
    %c0_2 = arith.constant 0 : index
    %0 = vector.load %arg3[%c0, %c0_0, %c0_1, %c0_2] : memref<1x1x72x128xbf16, #tpu.memory_space<vmem>>, vector<1x1x64x128xbf16>
    %1 = vector.shape_cast %0 : vector<1x1x64x128xbf16> to vector<64x128xbf16>
    %c0_3 = arith.constant 0 : index
    %c0_4 = arith.constant 0 : index
    %c8 = arith.constant 8 : index
    %c0_5 = arith.constant 0 : index
    %2 = vector.load %arg3[%c0_3, %c0_4, %c8, %c0_5] : memref<1x1x72x128xbf16, #tpu.memory_space<vmem>>, vector<1x1x64x128xbf16>
    %3 = vector.shape_cast %2 : vector<1x1x64x128xbf16> to vector<64x128xbf16>
    %c0_6 = arith.constant 0 : index
    %c0_7 = arith.constant 0 : index
    %c0_8 = arith.constant 0 : index
    %4 = vector.load %arg4[%c0_6, %c0_7, %c0_8] : memref<2x128x128xbf16, #tpu.memory_space<vmem>>, vector<1x128x128xbf16>
    %5 = vector.shape_cast %4 : vector<1x128x128xbf16> to vector<128x128xbf16>
    %cst = arith.constant dense<0.000000e+00> : vector<64x128xf32>
    %6 = tpu.matmul %1, %5, %cst {dimension_numbers = #tpu.dot_dimension_numbers<[1], [0], [0], [1], [0, 0, 1, 1], [], []>} : vector<64x128xbf16>, vector<128x128xbf16>, vector<64x128xf32> -> vector<64x128xf32>
    %c1 = arith.constant 1 : index
    %c0_9 = arith.constant 0 : index
    %c0_10 = arith.constant 0 : index
    %7 = vector.load %arg4[%c1, %c0_9, %c0_10] : memref<2x128x128xbf16, #tpu.memory_space<vmem>>, vector<1x128x128xbf16>
    %8 = vector.shape_cast %7 : vector<1x128x128xbf16> to vector<128x128xbf16>
    %cst_11 = arith.constant dense<0.000000e+00> : vector<64x128xf32>
    %9 = tpu.matmul %3, %8, %cst_11 {dimension_numbers = #tpu.dot_dimension_numbers<[1], [0], [0], [1], [0, 0, 1, 1], [], []>} : vector<64x128xbf16>, vector<128x128xbf16>, vector<64x128xf32> -> vector<64x128xf32>
    %10 = arith.addf %6, %9 : vector<64x128xf32>
    %cst_12 = arith.constant dense<0.000000e+00> : vector<128xf32>
    %11 = vector.multi_reduction <add>, %10, %cst_12 [0] : vector<64x128xf32> to vector<128xf32>
    %12 = vector.shape_cast %11 : vector<128xf32> to vector<1x128xf32>
    %13 = arith.mulf %10, %10 : vector<64x128xf32>
    %cst_13 = arith.constant dense<0.000000e+00> : vector<128xf32>
    %14 = vector.multi_reduction <add>, %13, %cst_13 [0] : vector<64x128xf32> to vector<128xf32>
    %15 = vector.shape_cast %14 : vector<128xf32> to vector<1x128xf32>
    %16 = tpu.concatenate %12, %15 in 0 : vector<1x128xf32>, vector<1x128xf32> -> vector<2x128xf32>
    %c0_14 = arith.constant 0 : index
    %c0_15 = arith.constant 0 : index
    %c0_16 = arith.constant 0 : index
    %c0_17 = arith.constant 0 : index
    %17 = vector.load %arg7[%c0_14, %c0_15, %c0_16, %c0_17] : memref<1x1x2x128xf32, #tpu.memory_space<vmem>>, vector<1x1x2x128xf32>
    %18 = vector.shape_cast %17 : vector<1x1x2x128xf32> to vector<2x128xf32>
    %19 = vector.shape_cast %16 : vector<2x128xf32> to vector<1x1x2x128xf32>
    tpu.vector_store %arg7[%c0_14, %c0_15, %c0_16, %c0_17], %19 {strides = array<i32>} : memref<1x1x2x128xf32, #tpu.memory_space<vmem>>, vector<1x1x2x128xf32>,
    %c0_18 = arith.constant 0 : index
    %c0_19 = arith.constant 0 : index
    %20 = vector.load %arg5[%c0_18, %c0_19] : memref<1x128xf32, #tpu.memory_space<vmem>>, vector<1x128xf32>
    %21 = vector.broadcast %20 : vector<1x128xf32> to vector<64x128xf32>
    %22 = arith.addf %10, %21 : vector<64x128xf32>
    %23 = arith.truncf %22 : vector<64x128xf32> to vector<64x128xbf16>
    %c0_20 = arith.constant 0 : index
    %c0_21 = arith.constant 0 : index
    %c0_22 = arith.constant 0 : index
    %c0_23 = arith.constant 0 : index
    %24 = vector.load %arg6[%c0_20, %c0_21, %c0_22, %c0_23] : memref<1x1x64x128xbf16, #tpu.memory_space<vmem>>, vector<1x1x64x128xbf16>
    %25 = vector.shape_cast %24 : vector<1x1x64x128xbf16> to vector<64x128xbf16>
    %26 = vector.shape_cast %23 : vector<64x128xbf16> to vector<1x1x64x128xbf16>
    tpu.vector_store %arg6[%c0_20, %c0_21, %c0_22, %c0_23], %26 {strides = array<i32>} : memref<1x1x64x128xbf16, #tpu.memory_space<vmem>>, vector<1x1x64x128xbf16>,
    return
  }
  func.func @transform_0(%arg0: i32, %arg1: i32, %arg2: i32) -> (i32, i32, i32, i32) {
    %c0_i32 = arith.constant 0 : i32
    %c0_i32_0 = arith.constant 0 : i32
    %c0_i32_1 = arith.constant 0 : i32
    return %arg1, %arg2, %c0_i32, %c0_i32_0 : i32, i32, i32, i32
  }
  func.func @transform_1(%arg0: i32, %arg1: i32, %arg2: i32) -> (i32, i32, i32) {
    %c0_i32 = arith.constant 0 : i32
    %c0_i32_0 = arith.constant 0 : i32
    %c0_i32_1 = arith.constant 0 : i32
    return %c0_i32, %c0_i32_0, %arg0 : i32, i32, i32
  }
  func.func @transform_2(%arg0: i32, %arg1: i32, %arg2: i32) -> (i32, i32) {
    %c0_i32 = arith.constant 0 : i32
    %c0_i32_0 = arith.constant 0 : i32
    return %c0_i32, %arg0 : i32, i32
  }
  func.func @transform_3(%arg0: i32, %arg1: i32, %arg2: i32) -> (i32, i32, i32, i32) {
    %c0_i32 = arith.constant 0 : i32
    %c0_i32_0 = arith.constant 0 : i32
    return %arg1, %arg2, %c0_i32, %arg0 : i32, i32, i32, i32
  }
  func.func @transform_4(%arg0: i32, %arg1: i32, %arg2: i32) -> (i32, i32, i32, i32) {
    %c0_i32 = arith.constant 0 : i32
    %c0_i32_0 = arith.constant 0 : i32
    return %arg1, %arg2, %c0_i32, %arg0 : i32, i32, i32, i32
  }
}

</mosaic_0001>

<bundles_post_ra>
// kernel: unet_down_block.1
= control target key start
LH: loop header
LB: loop body
LE: loop exit
PB: predicated region body
PF: predicated region fallthrough
CT: control target
= control target key end

     0   :  { %s1179_s15 = smov 0   ;;  %s1181_s16 = smov 0   ;;  %s1287_s0 = inlined_call_operand.vmem [shape: bf16[2,1,72,128], index: 0, kind: input, shape index: {}]   ;;  %s1288_s1 = inlined_call_operand.vmem [shape: bf16[2,128,128], index: 1, kind: input, shape index: {}]   ;;  %s1289_s2 = inlined_call_operand.vmem [shape: f32[1,128], index: 2, kind: input, shape index: {}]   ;;  %s1290_s3 = inlined_call_operand.vmem [shape: bf16[2,1,64,128], index: 3, kind: output, shape index: {0}]   ;;  %s1291_s4 = inlined_call_operand.vmem [shape: f32[2,1,2,128], index: 4, kind: output, shape index: {1}]  }
   0x1   :  { %s1183_s17 = smov 0  }
   0x2 LB: > { %s30_s18 = sadd.s32 1, %s1148_s16  ;;  %p913_p0 = scmp.ge.s32.totalorder %s1152_s17, 1  ;;  %s1152_s17 = sphi %s1183_s17, %s15_s17   ;;  %s1148_s16 = sphi %s1181_s16, %s1293_s16   ;;  %s1144_s15 = sphi %s1179_s15, %s1292_s15  }
   0x3   : > { %p32_p1 = scmp.ge.s32.totalorder %s30_s18, 2  ;;  %p215_p2 = scmp.lt.s32.totalorder %s1152_s17, 3 }
   0x5   : > { %s1295_s18 = smov (%p32_p1, %s30_s18), 0  ;;  %p216_p3 = pnand %p913_p0, %p215_p2 }
   0x6   : > { %v1106_v0 = vld [vmem:[%s1288_s1 + $0x40] sm:$0xff] (!%p216_p3)   ;;  %p269_p4 = scmp.lt.s32.totalorder (!%p216_p3), %s1144_s15, 1  ;;  %v1108_v2 = vld [vmem:[%s1288_s1 + $0x48] sm:$0xff] (!%p216_p3)   ;;  %v1110_v4 = vld [vmem:[%s1288_s1 + $0x50] sm:$0xff] (!%p216_p3)   ;;  %vm665_vm0 = vcmask (!%p216_p3), 1040384  }
   0x7   : > { %219 = sbr.rel (%p216_p3) target bundleno = 287 (0x11f), region = 32  ;;  %v1107_v1 = vld [vmem:[%s1288_s1] sm:$0xff] (!%p216_p3)   ;;  %1025 = vmatprep.subr.bf16.mxu1 (!%p216_p3), %v1106_v0  ;;  %v1109_v3 = vld [vmem:[%s1288_s1 + $0x8] sm:$0xff] (!%p216_p3)   ;;  %v1111_v5 = vld [vmem:[%s1288_s1 + $0x10] sm:$0xff] (!%p216_p3)  }
   0x8   : > { %1049 = vmatprep.subr.bf16.mxu0 (!%p216_p3), %v1107_v1  ;;  %1026 = vmatpush3.bf16.msra.mxu1 (!%p216_p3), %v1106_v0  ;;  %v1112_v6 = vld [vmem:[%s1288_s1 + $0x58] sm:$0xff] (!%p216_p3)   ;;  %v1114_v8 = vld [vmem:[%s1288_s1 + $0x60] sm:$0xff] (!%p216_p3)   ;;  %v1116_v10 = vld [vmem:[%s1288_s1 + $0x68] sm:$0xff] (!%p216_p3)  }
   0x9   : > { %1050 = vmatpush3.bf16.msra.mxu0 (!%p216_p3), %v1107_v1  ;;  %1027 = vmatprep.subr.bf16.mxu1 (!%p216_p3), %v1108_v2  ;;  %v1113_v7 = vld [vmem:[%s1288_s1 + $0x18] sm:$0xff] (!%p216_p3)   ;;  %v1115_v9 = vld [vmem:[%s1288_s1 + $0x20] sm:$0xff] (!%p216_p3)   ;;  %v1117_v11 = vld [vmem:[%s1288_s1 + $0x28] sm:$0xff] (!%p216_p3)  }
   0xa   : > { %1051 = vmatprep.subr.bf16.mxu0 (!%p216_p3), %v1109_v3  ;;  %v1118_v14 = vld [vmem:[%s1288_s1 + $0x70] sm:$0xff] (!%p216_p3)   ;;  %v1120_v16 = vld [vmem:[%s1288_s1 + $0x78] sm:$0xff] (!%p216_p3)   ;;  %v958_v30 = vld [vmem:[%s1289_s2] ss:$0 sm:$0xff] (!%p216_p3) }
   0xb   : > { %v1119_v15 = vld [vmem:[%s1288_s1 + $0x30] sm:$0xff] (!%p216_p3)   ;;  %v1121_v17 = vld [vmem:[%s1288_s1 + $0x38] sm:$0xff] (!%p216_p3)  }
   0xc   : > { %1028 = vmatpush3.bf16.msra.mxu1 (!%p216_p3), %v1108_v2 }
   0xd   : > { %1052 = vmatpush3.bf16.msra.mxu0 (!%p216_p3), %v1109_v3  ;;  %1029 = vmatprep.subr.bf16.mxu1 (!%p216_p3), %v1110_v4 }
   0xe   : > { %s1297_s15 = smov (!%p269_p4, %s1144_s15), 1  ;;  %1053 = vmatprep.subr.bf16.mxu0 %v1111_v5 }
   0xf   : > { %s1081_s9 = smul.u32 36, %s1297_s15  ;;  %s917_s13 = sshll.u32 %s1297_s15, 1 }
  0x10   : > { %1030 = vmatpush3.bf16.msra.mxu1 %v1110_v4 }
  0x11   : > { %1054 = vmatpush3.bf16.msra.mxu0 %v1111_v5  ;;  %1031 = vmatprep.subr.bf16.mxu1 %v1112_v6  ;;  %s1233_s20 = scalar_lea.vmem %s1287_s0, %s1081_s9  ;;  %s969_s9 = sshll.u32 %s1297_s15, 5 }
  0x12   : > { %1055 = vmatprep.subr.bf16.mxu0 %v1113_v7  ;;  %v1122_v12 = vld [vmem:[%s1233_s20 + $0x4] sm:$0xff]   ;;  %v1124_v18 = vld [vmem:[%s1233_s20 + $0xc] sm:$0xff]   ;;  %v1126_v20 = vld [vmem:[%s1233_s20 + $0x14] sm:$0xff]   ;;  %s1268_s12 = scalar_lea.vmem %s1290_s3, %s969_s9 }
  0x13   : > { %v1123_v13 = vld [vmem:[%s1233_s20] sm:$0xff]   ;;  %1041 = vmatprep.mubr.bf16.mxu1 %v1122_v12  ;;  %v1125_v19 = vld [vmem:[%s1233_s20 + $0x8] sm:$0xff]   ;;  %v1127_v21 = vld [vmem:[%s1233_s20 + $0x10] sm:$0xff]  }
  0x14   : > { %1032 = vmatpush3.bf16.msra.mxu1 %v1112_v6  ;;  %1065 = vmatprep.mubr.bf16.mxu0 %v1123_v13  ;;  %v1128_v22 = vld [vmem:[%s1233_s20 + $0x1c] sm:$0xff]  }
  0x15   : > { %1056 = vmatpush3.bf16.msra.mxu0 %v1113_v7  ;;  %1033 = vmatprep.subr.bf16.mxu1 %v1114_v8  ;;  %v1129_v23 = vld [vmem:[%s1233_s20 + $0x18] sm:$0xff]   ;;  %s306_s20 = scalar_lea.vmem %s1291_s4, %s917_s13 }
  0x16   : > { %1057 = vmatprep.subr.bf16.mxu0 %v1115_v9 }
  0x18   : > { %1034 = vmatpush3.bf16.msra.mxu1 %v1114_v8 }
  0x19   : > { %1058 = vmatpush3.bf16.msra.mxu0 %v1115_v9  ;;  %1035 = vmatprep.subr.bf16.mxu1 %v1116_v10 }
  0x1a   : > { %1059 = vmatprep.subr.bf16.mxu0 %v1117_v11 }
  0x1c   : > { %1036 = vmatpush3.bf16.msra.mxu1 %v1116_v10 }
  0x1d   : > { %1060 = vmatpush3.bf16.msra.mxu0 %v1117_v11  ;;  %1037 = vmatprep.subr.bf16.mxu1 %v1118_v14 }
  0x1e   : > { %1061 = vmatprep.subr.bf16.mxu0 %v1119_v15 }
  0x20   : > { %1038 = vmatpush3.bf16.msra.mxu1 %v1118_v14 }
  0x21   : > { %1062 = vmatpush3.bf16.msra.mxu0 %v1119_v15  ;;  %1039 = vmatprep.subr.bf16.mxu1 %v1120_v16 }
  0x22   : > { %1063 = vmatprep.subr.bf16.mxu0 %v1121_v17 }
  0x24   : > { %1040 = vmatpush3.bf16.msra.mxu1 %v1120_v16 }
  0x25   : > { %1064 = vmatpush3.bf16.msra.mxu0 %v1121_v17 }
  0x27   : > { %1042 = vmatmul.mubr.bf16.vlgmr.msra.gmra.mrb[0].mxu1 %v1124_v18 }
  0x28   : > { %1066 = vmatmul.mubr.bf16.vlgmr.msra.gmra.mrb[0].mxu0 %v1125_v19  ;;  %1045 = vmatprep.mubr.bf16.mxu1 %v1126_v20 }
  0x29   : > { %1069 = vmatprep.mubr.bf16.mxu0 %v1127_v21 }
  0x2f   : > { %1046 = vmatmul.mubr.bf16.gmra.mrb[4].mxu1 %v1128_v22 }
  0x30   : > { %1070 = vmatmul.mubr.bf16.gmra.mrb[4].mxu0 %v1129_v23 }
  0xfa   : > { %v1043_v24 = vpop.f32.mrb[0].mxu1 }
  0xfb   : > { %v1067_v25 = vpop.f32.mrb[0].mxu0  ;;  %v463_v26 = vpop.f32.mrb[1].mxu1 }
  0xfc   : > { %v609_v27 = vadd.f32 %v1067_v25, %v1043_v24  ;;  %v600_v28 = vpop.f32.mrb[1].mxu0  ;;  %v1044_v29 = vpop.f32.mrb[2].mxu1 }
  0xfd   : > { %v601_v31 = vadd.f32 %v600_v28, %v463_v26  ;;  %v1068_v32 = vpop.f32.mrb[2].mxu0  ;;  %v466_v33 = vpop.f32.mrb[3].mxu1 }
  0xfe   : > { %v612_v34 = vadd.f32 %v1068_v32, %v1044_v29  ;;  %v603_v35 = vpop.f32.mrb[3].mxu0  ;;  %v677_v37 = vadd.f32 %v958_v30, %v609_v27  ;;  %v646_v46 = vmul.f32 %v609_v27, %v609_v27 }
  0xff   : > { %v604_v36 = vadd.f32 %v603_v35, %v466_v33  ;;  %v644_v38 = vmul.f32 %v601_v31, %v601_v31  ;;  %v675_v40 = vadd.f32 %v958_v30, %v601_v31 }
 0x100   : > { %v678_v39 = vadd.f32 %v958_v30, %v612_v34  ;;  %v647_v55 = vmul.f32 %v612_v34, %v612_v34 }
 0x101   : > { %v631_v41 = vadd.f32 %v604_v36, %v601_v31  ;;  %v645_v42 = vmul.f32 %v604_v36, %v604_v36  ;;  %v676_v43 = vadd.f32 %v958_v30, %v604_v36 }
 0x102   : > { %v986_v44 = vpack.c.bf16 %v678_v39, %v677_v37  ;;  %v1047_v45 = vpop.f32.mrb[4].mxu1 }
 0x103   : > { %v632_v47 = vadd.f32 %v631_v41, %v609_v27  ;;  %v652_v48 = vadd.f32 %v645_v42, %v644_v38  ;;  %v981_v49 = vpack.c.bf16 %v676_v43, %v675_v40  ;;  %v1071_v50 = vpop.f32.mrb[4].mxu0  ;;  %v479_v51 = vpop.f32.mrb[5].mxu1 }
 0x104   : > { %998 = vst [vmem:[%s1268_s12 + $0x8] sm:$0xff] %v986_v44   ;;  %v625_v52 = vadd.f32 %v1071_v50, %v1047_v45  ;;  %v616_v53 = vpop.f32.mrb[5].mxu0  ;;  %v1048_v54 = vpop.f32.mrb[6].mxu1 }
 0x105   : > { %v653_v56 = vadd.f32 %v652_v48, %v646_v46  ;;  %982 = vst [vmem:[%s1268_s12] sm:$0xff] %v981_v49   ;;  %v617_v57 = vadd.f32 %v616_v53, %v479_v51  ;;  %v633_v58 = vadd.f32 %v632_v47, %v612_v34  ;;  %v1072_v59 = vpop.f32.mrb[6].mxu0  ;;  %v482_v60 = vpop.f32.mrb[7].mxu1 }
 0x106   : > { %v628_v61 = vadd.f32 %v1072_v59, %v1048_v54  ;;  %v619_v62 = vpop.f32.mrb[7].mxu0  ;;  %v681_v2 = vadd.f32 %v958_v30, %v625_v52  ;;  %v650_v11 = vmul.f32 %v625_v52, %v625_v52 }
 0x107   : > { %v634_v63 = vadd.f32 %v633_v58, %v617_v57  ;;  %v648_v0 = vmul.f32 %v617_v57, %v617_v57  ;;  %v654_v1 = vadd.f32 %v653_v56, %v647_v55  ;;  %v620_v4 = vadd.f32 %v619_v62, %v482_v60 }
 0x108   : > { %v682_v3 = vadd.f32 %v958_v30, %v628_v61  ;;  %v679_v6 = vadd.f32 %v958_v30, %v617_v57  ;;  %v651_v15 = vmul.f32 %v628_v61, %v628_v61 }
 0x109   : > { %v655_v5 = vadd.f32 %v654_v1, %v648_v0  ;;  %v635_v8 = vadd.f32 %v634_v63, %v620_v4  ;;  %v649_v9 = vmul.f32 %v620_v4, %v620_v4  ;;  %v680_v10 = vadd.f32 %v958_v30, %v620_v4 }
 0x10a   : > { %v996_v7 = vpack.c.bf16 %v682_v3, %v681_v2 }
 0x10b   : > { %v636_v12 = vadd.f32 %v635_v8, %v625_v52  ;;  %v656_v13 = vadd.f32 %v655_v5, %v649_v9  ;;  %v991_v14 = vpack.c.bf16 %v680_v10, %v679_v6 }
 0x10c   : > { %1000 = vst [vmem:[%s1268_s12 + $0x18] sm:$0xff] %v996_v7  }
 0x10d   : > { %v637_v16 = vadd.f32 %v636_v12, %v628_v61  ;;  %v657_v17 = vadd.f32 %v656_v13, %v650_v11  ;;  %999 = vst [vmem:[%s1268_s12 + $0x10] sm:$0xff] %v991_v14  }
 0x10f   : > { %v638_v18 = vrot.slane %v637_v16, 4  ;;  %v658_v19 = vadd.f32 %v657_v17, %v651_v15 }
 0x111   : > { %v639_v20 = vadd.f32 %v638_v18, %v637_v16  ;;  %v659_v21 = vrot.slane %v658_v19, 4 }
 0x113   : > { %v640_v22 = vrot.slane %v639_v20, 2  ;;  %v660_v23 = vadd.f32 %v659_v21, %v658_v19 }
 0x115   : > { %v641_v24 = vadd.f32 %v640_v22, %v639_v20  ;;  %v661_v25 = vrot.slane %v660_v23, 2 }
 0x117   : > { %v642_v26 = vrot.slane %v641_v24, 1  ;;  %v662_v27 = vadd.f32 %v661_v25, %v660_v23 }
 0x119   : > { %v663_v28 = vrot.slane %v662_v27, 1  ;;  %v643_v29 = vadd.f32 %v642_v26, %v641_v24 }
 0x11b   : > { %v664_v30 = vadd.f32 %v663_v28, %v662_v27 }
 0x11d   : > { %v666_v31 = vsel %vm665_vm0, %v643_v29, %v664_v30 }
 0x11e   : > { %667 = vst [vmem:[%s306_s20] sm:$0x3] %v666_v31 }
 0x11f PF: > { %s15_s17 = sadd.s32 1, %s1152_s17   ;;  %s1292_s15 = smov %s1148_s16 }
 0x120   : > { %p12_p5 = scmp.ge.s32.totalorder %s15_s17, 4   ;;  %s1293_s16 = smov %s1295_s18 }
 0x122   :  { %14 = sbr.rel (!%p12_p5) target bundleno = 2 (0x2), region = 81 }

</bundles_post_ra>
